<compile_context>
chip_gen: v7x
topology: tpu7x:2x2x1
jax: 0.10.0
libtpu: 0.0.40
codegen_flags: <defaults>
</compile_context>

<pallas_src>
import functools

import jax
import jax.numpy as jnp
from jax import lax
from jax.experimental import pallas as pl
from jax.experimental.pallas import tpu as pltpu


def dual_attention_kernel(src_ref, main_ref, pos_ref,
                          wmain_ref, wpos_ref, wc_ref, ws_ref,
                          attn_h_ref, align_ref, main_align_ref, pos_align_ref,
                          s_main_scr, s_pos_scr, ctx_acc,
                          *, l_chunk):
    # Per-grid-step tiles (batch-blocked; bank streamed in native time-major layout):
    #   src_ref  : (Bt, Dm)
    #   main_ref : (L, Bt, Dm)   pos_ref : (L, Bt, Dp)
    #   wmain_ref: (Dm, Dm)      wpos_ref: (Dm, Dp)
    #   wc_ref   : (Dm, Dm) = linear_out.weight[:, :Dm].T
    #   ws_ref   : (Dm, Dm) = linear_out.weight[:, Dm:].T
    # scratch:
    #   s_main_scr / s_pos_scr : (L, Bt) f32     ctx_acc : (Bt, Dm) f32
    L = main_ref.shape[0]
    src = src_ref[...]                                   # (Bt, Dm), native dtype

    # 'general' scorer via matmul associativity: project the query, not the bank.
    q_main = jnp.dot(src, wmain_ref[...], preferred_element_type=jnp.float32)  # (Bt, Dm) f32
    q_pos = jnp.dot(src, wpos_ref[...], preferred_element_type=jnp.float32)    # (Bt, Dp) f32
    # bank-dtype copies for the VALU products (bf16 banks stay bf16), hoisted
    # out of the chunk loop.
    q_main_c = q_main.astype(main_ref.dtype)
    q_pos_c = q_pos.astype(pos_ref.dtype)

    n_full = L // l_chunk
    rem = L - n_full * l_chunk

    def _for_each_chunk(fn):
        # Static single-chunk path (also the tiny-shape / test path); dynamic
        # scf.for otherwise, with tile-aligned starts hinted via multiple_of.
        if n_full <= 1:
            if n_full:
                fn(0, l_chunk)
        else:
            def body(i, carry):
                fn(pl.multiple_of(i * l_chunk, l_chunk), l_chunk)
                return carry
            lax.fori_loop(0, n_full, body, 0)
        if rem:
            fn(n_full * l_chunk, rem)

    # ---- pass 1: raw scores in (L, Bt) orientation, fused mul + lane-reduce
    # over D, chunked over L so no full (L, Bt, Dm) f32 temporary exists.
    def _score_chunk(start, size):
        m = main_ref[pl.ds(start, size), :, :]            # (size, Bt, Dm)
        p = pos_ref[pl.ds(start, size), :, :]             # (size, Bt, Dp)
        sm = (m * q_main_c[None, :, :]).astype(jnp.float32)
        sp = (p * q_pos_c[None, :, :]).astype(jnp.float32)
        s_main_scr[pl.ds(start, size), :] = jnp.sum(sm, axis=2)
        s_pos_scr[pl.ds(start, size), :] = jnp.sum(sp, axis=2)

    _for_each_chunk(_score_chunk)

    # ---- softmax over L in the natural (L, Bt) orientation (VPU reductions).
    s_main = s_main_scr[...]                              # (L, Bt) f32
    s_pos = s_pos_scr[...]

    def _softmax_over_l(s):
        m_ = jnp.max(s, axis=0, keepdims=True)
        e = jnp.exp(s - m_)
        return e / jnp.sum(e, axis=0, keepdims=True)

    a_main = _softmax_over_l(s_main)
    a_pos = _softmax_over_l(s_pos)
    # softmax(a)*softmax(b) renormalized == softmax(a + b)   (stable).
    align = _softmax_over_l(s_main + s_pos)

    # One transpose per align output at store time (module's (B, L) layout).
    main_align_ref[...] = a_main.T.astype(main_align_ref.dtype)
    pos_align_ref[...] = a_pos.T.astype(pos_align_ref.dtype)
    align_ref[...] = align.T.astype(align_ref.dtype)

    # ---- pass 2: context vector, fused weight*bank sublane-reduce over L.
    # Reuse s_main_scr to hold align so chunks can be sliced through the ref.
    s_main_scr[...] = align
    ctx_acc[...] = jnp.zeros_like(ctx_acc)

    def _ctx_chunk(start, size):
        m = main_ref[pl.ds(start, size), :, :]            # (size, Bt, Dm)
        w = s_main_scr[pl.ds(start, size), :]             # (size, Bt) f32
        ctx_acc[...] += jnp.sum(m * w[:, :, None], axis=0)  # f32 accumulate

    _for_each_chunk(_ctx_chunk)

    # ---- output projection: linear_out(concat([c_t, src])) ==
    #   c_t @ Wout[:, :Dm].T + src @ Wout[:, Dm:].T   (both weights resident)
    c_t = ctx_acc[...]                                    # (Bt, Dm) f32
    h = jnp.tanh(jnp.dot(c_t.astype(wc_ref.dtype), wc_ref[...],
                         preferred_element_type=jnp.float32)
                 + jnp.dot(src, ws_ref[...], preferred_element_type=jnp.float32))
    attn_h_ref[...] = h.astype(attn_h_ref.dtype)


def _round_up(x, m):
    return ((x + m - 1) // m) * m


def _default_vmem_limit_bytes():
    # Physical VMEM: 128 MiB on v5e/v6e, 64 MiB per TensorCore on v7x; scoped
    # defaults (16/32 MiB) are far smaller, so always set an explicit limit
    # with headroom for Mosaic-internal scratch.
    try:
        cap = pltpu.get_tpu_info().vmem_capacity_bytes
    except Exception:  # older jax / query unavailable: assume the tightest part
        cap = 64 * 1024 * 1024
    return int(min(max(cap - 16 * 1024 * 1024, 32 * 1024 * 1024),
                   110 * 1024 * 1024))


def _pick_batch_block(B, L, Dm, Dp, itemsize, vmem_limit_bytes, tile, min_steps):
    # Fixed residents: four weight blocks (conservatively x2 buffers) plus
    # headroom for the bounded per-chunk temporaries / Mosaic scratch.
    weights = itemsize * (3 * Dm * Dm + Dm * Dp)
    budget = vmem_limit_bytes - 2 * weights - 2 * 1024 * 1024
    # Per-batch-row footprint.  per_row already contains the double-buffering
    # factors, so the budget is NOT halved again.
    per_row = 2 * itemsize * (L * (Dm + Dp) + Dm)        # double-buffered streamed inputs
    per_row += 4 * (5 * L + Dm)                          # f32 score/align/ctx temporaries
    per_row += 2 * (3 * 4 * L + itemsize * Dm)           # double-buffered outputs
    bt_vmem = budget // max(per_row, 1)
    # Keep >= min_steps grid steps so the bank DMA is pipelined (and both TCs
    # get work on v7x with dimension_semantics=("parallel",)).
    bt_pipe = _round_up((B + min_steps - 1) // min_steps, tile)
    bt = min(bt_vmem, bt_pipe, _round_up(B, tile))
    bt = max(tile, (bt // tile) * tile)
    # TODO(synk): if even one batch tile exceeds the budget (very long L), tile
    # L with an "arbitrary" grid axis + online-softmax accumulator instead of
    # relying on this clamp.
    return int(bt)


def dual_attention(source, main_embs_tbd, pos_embs_tbd, w_main, w_pos, w_out,
                   *, batch_block=None, vmem_limit_bytes=None, min_grid_steps=4):
    """source: (B, Dm); main_embs_tbd: (L, B, Dm); pos_embs_tbd: (L, B, Dp).

    Weights follow the torch.nn.Linear convention (y = x @ W.T):
      w_main: (Dm, Dm)   main_scorer.linear_in.weight
      w_pos : (Dm, Dp)   pos_scorer.linear_in.weight
      w_out : (Dm, 2*Dm) linear_out.weight (bias=False for attn_type='general')
    """
    B, Dm = source.shape
    L, B2, Dm2 = main_embs_tbd.shape
    Dp = pos_embs_tbd.shape[2]
    assert B2 == B and Dm2 == Dm
    assert w_main.shape == (Dm, Dm) and w_pos.shape == (Dm, Dp)
    assert w_out.shape == (Dm, 2 * Dm)

    # One-time weight prep in XLA (no per-step transposes / column slices in
    # kernel).  Weights are kept in the activations' dtype so bf16 callers get
    # bf16 MXU operands (f32 accumulation via preferred_element_type) and half
    # the resident-weight VMEM.
    wdt = source.dtype
    w_main_k = w_main.astype(wdt)
    w_pos_k = w_pos.astype(wdt)
    w_c = jnp.transpose(w_out[:, :Dm]).astype(wdt)       # (Dm, Dm): multiplies c_t
    w_s = jnp.transpose(w_out[:, Dm:]).astype(wdt)       # (Dm, Dm): multiplies src

    if vmem_limit_bytes is None:
        vmem_limit_bytes = _default_vmem_limit_bytes()

    itemsize = source.dtype.itemsize
    tile = {4: 8, 2: 16, 1: 32}.get(itemsize, 8)         # sublane tile per dtype
    if batch_block is None:
        Bt = _pick_batch_block(B, L, Dm, Dp, itemsize, vmem_limit_bytes, tile,
                               max(1, int(min_grid_steps)))
    else:
        Bt = max(tile, (min(int(batch_block), _round_up(B, tile)) // tile) * tile)

    # Bound each fused multiply+reduce chunk's in-flight f32 product to
    # ~256 KiB so Mosaic never materializes a full (L, Bt, Dm) temporary.
    lc = (256 * 1024) // max(1, 4 * Bt * (Dm + Dp))
    l_chunk = min(L, max(8, (lc // 8) * 8))

    grid = (pl.cdiv(B, Bt),)
    kernel = functools.partial(dual_attention_kernel, l_chunk=l_chunk)

    out_shape = (
        jax.ShapeDtypeStruct((B, Dm), source.dtype),     # attn_h
        jax.ShapeDtypeStruct((B, L), jnp.float32),       # align_vectors
        jax.ShapeDtypeStruct((B, L), jnp.float32),       # main_align
        jax.ShapeDtypeStruct((B, L), jnp.float32),       # pos_align
    )
    grid_spec = pltpu.PrefetchScalarGridSpec(
        num_scalar_prefetch=0,
        grid=grid,
        in_specs=[
            pl.BlockSpec((Bt, Dm), lambda b: (b, 0)),          # src
            pl.BlockSpec((L, Bt, Dm), lambda b: (0, b, 0)),    # main bank (time-major)
            pl.BlockSpec((L, Bt, Dp), lambda b: (0, b, 0)),    # pos bank (time-major)
            pl.BlockSpec((Dm, Dm), lambda b: (0, 0)),          # w_main (resident)
            pl.BlockSpec((Dm, Dp), lambda b: (0, 0)),          # w_pos  (resident)
            pl.BlockSpec((Dm, Dm), lambda b: (0, 0)),          # w_c    (resident)
            pl.BlockSpec((Dm, Dm), lambda b: (0, 0)),          # w_s    (resident)
        ],
        out_specs=(
            pl.BlockSpec((Bt, Dm), lambda b: (b, 0)),
            pl.BlockSpec((Bt, L), lambda b: (b, 0)),
            pl.BlockSpec((Bt, L), lambda b: (b, 0)),
            pl.BlockSpec((Bt, L), lambda b: (b, 0)),
        ),
        scratch_shapes=[
            pltpu.VMEM((L, Bt), jnp.float32),   # raw main scores (reused for align)
            pltpu.VMEM((L, Bt), jnp.float32),   # raw pos scores
            pltpu.VMEM((Bt, Dm), jnp.float32),  # context accumulator
        ],
    )
    attn_h, align, main_align, pos_align = pl.pallas_call(
        kernel,
        out_shape=out_shape,
        grid_spec=grid_spec,
        compiler_params=pltpu.CompilerParams(
            dimension_semantics=("parallel",),
            vmem_limit_bytes=int(vmem_limit_bytes),
        ),
    )(source, main_embs_tbd, pos_embs_tbd, w_main_k, w_pos_k, w_c, w_s)

    ret = {
        "": align,
        "_main_align": main_align,
        "_pos_align": pos_align,
    }
    return attn_h, ret


def dual_attention_reference(source, main_embs_tbd, pos_embs_tbd, w_main, w_pos, w_out):
    """Pure-JAX reference mirroring the PyTorch forward (attn_type='general')."""
    main = jnp.transpose(main_embs_tbd, (1, 0, 2)).astype(jnp.float32)
    pos = jnp.transpose(pos_embs_tbd, (1, 0, 2)).astype(jnp.float32)
    src = source[:, None, :].astype(jnp.float32)
    pm = main @ w_main.T
    pp = pos @ w_pos.T
    s_main = jnp.einsum("bqd,bld->bql", src, pm)
    s_pos = jnp.einsum("bqd,bld->bql", src, pp)
    a_main = jax.nn.softmax(s_main, axis=-1)
    a_pos = jax.nn.softmax(s_pos, axis=-1)
    align = a_main * a_pos
    align = align / align.sum(-1, keepdims=True)
    c_t = jnp.einsum("bql,bld->bqd", align, main)
    concat = jnp.concatenate([c_t, src], axis=-1)
    h = jnp.tanh(concat @ w_out.T)
    return h[:, 0], align[:, 0], a_main[:, 0], a_pos[:, 0]


if __name__ == "__main__":
    B, L, Dm, Dp = 8, 16, 32, 16
    key = jax.random.PRNGKey(0)
    ks = jax.random.split(key, 6)

    source = jax.random.normal(ks[0], (B, Dm), dtype=jnp.float32)
    main_embs = jax.random.normal(ks[1], (L, B, Dm), dtype=jnp.float32)
    pos_embs = jax.random.normal(ks[2], (L, B, Dp), dtype=jnp.float32)
    # deterministic "Linear" weights (torch convention: (out_features, in_features))
    w_main = jax.random.normal(ks[3], (Dm, Dm), dtype=jnp.float32) / jnp.sqrt(Dm)
    w_pos = jax.random.normal(ks[4], (Dm, Dp), dtype=jnp.float32) / jnp.sqrt(Dp)
    w_out = jax.random.normal(ks[5], (Dm, 2 * Dm), dtype=jnp.float32) / jnp.sqrt(2.0 * Dm)

    attn_h, ret = dual_attention(source, main_embs, pos_embs, w_main, w_pos, w_out)
    jax.block_until_ready(attn_h)
    for v in ret.values():
        jax.block_until_ready(v)

    # validate against pure-JAX reference
    r_h, r_align, r_ma, r_pa = dual_attention_reference(
        source, main_embs, pos_embs, w_main, w_pos, w_out)
    assert jnp.allclose(attn_h, r_h, atol=1e-5, rtol=1e-5), "attn_h mismatch"
    assert jnp.allclose(ret[""], r_align, atol=1e-5, rtol=1e-5), "align mismatch"
    assert jnp.allclose(ret["_main_align"], r_ma, atol=1e-5, rtol=1e-5), "main_align mismatch"
    assert jnp.allclose(ret["_pos_align"], r_pa, atol=1e-5, rtol=1e-5), "pos_align mismatch"

    print("KERNEL_OK")
</pallas_src>

<mosaic_0001>
module attributes {stable_mosaic.version = 11 : i64} {
  func.func @dual_attention_kernel(%arg0: i32, %arg1: memref<8x32xf32, #tpu.memory_space<vmem>>, %arg2: memref<16x8x32xf32, #tpu.memory_space<vmem>>, %arg3: memref<16x8x16xf32, #tpu.memory_space<vmem>>, %arg4: memref<32x32xf32, #tpu.memory_space<vmem>>, %arg5: memref<32x16xf32, #tpu.memory_space<vmem>>, %arg6: memref<32x32xf32, #tpu.memory_space<vmem>>, %arg7: memref<32x32xf32, #tpu.memory_space<vmem>>, %arg8: memref<8x32xf32, #tpu.memory_space<vmem>>, %arg9: memref<8x16xf32, #tpu.memory_space<vmem>>, %arg10: memref<8x16xf32, #tpu.memory_space<vmem>>, %arg11: memref<8x16xf32, #tpu.memory_space<vmem>>, %arg12: memref<16x8xf32, #tpu.memory_space<vmem>>, %arg13: memref<16x8xf32, #tpu.memory_space<vmem>>, %arg14: memref<8x32xf32, #tpu.memory_space<vmem>>) attributes {dimension_semantics = [#tpu.dimension_semantics<parallel>], iteration_bounds = array<i64: 1>, scalar_prefetch = 0 : i64, scratch_operands = 3 : i64, tpu.core_type = #tpu.core_type<tc>, window_params = [{transform_indices = @transform_0, window_bounds = array<i64: 8, 32>}, {transform_indices = @transform_1, window_bounds = array<i64: 16, 8, 32>}, {transform_indices = @transform_2, window_bounds = array<i64: 16, 8, 16>}, {pipeline_mode = #tpu.pipeline_mode<synchronous>, transform_indices = @transform_3, window_bounds = array<i64: 32, 32>}, {pipeline_mode = #tpu.pipeline_mode<synchronous>, transform_indices = @transform_4, window_bounds = array<i64: 32, 16>}, {pipeline_mode = #tpu.pipeline_mode<synchronous>, transform_indices = @transform_5, window_bounds = array<i64: 32, 32>}, {pipeline_mode = #tpu.pipeline_mode<synchronous>, transform_indices = @transform_6, window_bounds = array<i64: 32, 32>}, {transform_indices = @transform_7, window_bounds = array<i64: 8, 32>}, {transform_indices = @transform_8, window_bounds = array<i64: 8, 16>}, {transform_indices = @transform_9, window_bounds = array<i64: 8, 16>}, {transform_indices = @transform_10, window_bounds = array<i64: 8, 16>}]} {
    %c0 = arith.constant 0 : index
    %c0_0 = arith.constant 0 : index
    %0 = vector.load %arg1[%c0, %c0_0] : memref<8x32xf32, #tpu.memory_space<vmem>>, vector<8x32xf32>
    %c0_1 = arith.constant 0 : index
    %c0_2 = arith.constant 0 : index
    %1 = vector.load %arg4[%c0_1, %c0_2] : memref<32x32xf32, #tpu.memory_space<vmem>>, vector<32x32xf32>
    %cst = arith.constant dense<0.000000e+00> : vector<8x32xf32>
    %2 = tpu.matmul %0, %1, %cst {dimension_numbers = #tpu.dot_dimension_numbers<[1], [0], [0], [1], [0, 0, 1, 1], [], []>} : vector<8x32xf32>, vector<32x32xf32>, vector<8x32xf32> -> vector<8x32xf32>
    %c0_3 = arith.constant 0 : index
    %c0_4 = arith.constant 0 : index
    %3 = vector.load %arg5[%c0_3, %c0_4] : memref<32x16xf32, #tpu.memory_space<vmem>>, vector<32x16xf32>
    %cst_5 = arith.constant dense<0.000000e+00> : vector<8x16xf32>
    %4 = tpu.matmul %0, %3, %cst_5 {dimension_numbers = #tpu.dot_dimension_numbers<[1], [0], [0], [1], [0, 0, 1, 1], [], []>} : vector<8x32xf32>, vector<32x16xf32>, vector<8x16xf32> -> vector<8x16xf32>
    %c0_6 = arith.constant 0 : index
    %c0_7 = arith.constant 0 : index
    %c0_8 = arith.constant 0 : index
    %5 = vector.load %arg2[%c0_6, %c0_7, %c0_8] : memref<16x8x32xf32, #tpu.memory_space<vmem>>, vector<16x8x32xf32>
    %c0_9 = arith.constant 0 : index
    %c0_10 = arith.constant 0 : index
    %c0_11 = arith.constant 0 : index
    %6 = vector.load %arg3[%c0_9, %c0_10, %c0_11] : memref<16x8x16xf32, #tpu.memory_space<vmem>>, vector<16x8x16xf32>
    %7 = vector.shape_cast %2 : vector<8x32xf32> to vector<1x8x32xf32>
    %8 = vector.broadcast %7 : vector<1x8x32xf32> to vector<16x8x32xf32>
    %9 = arith.mulf %5, %8 : vector<16x8x32xf32>
    %10 = vector.shape_cast %4 : vector<8x16xf32> to vector<1x8x16xf32>
    %11 = vector.broadcast %10 : vector<1x8x16xf32> to vector<16x8x16xf32>
    %12 = arith.mulf %6, %11 : vector<16x8x16xf32>
    %cst_12 = arith.constant dense<0.000000e+00> : vector<16x8xf32>
    %13 = vector.multi_reduction <add>, %9, %cst_12 [2] : vector<16x8x32xf32> to vector<16x8xf32>
    %c0_13 = arith.constant 0 : index
    %c0_14 = arith.constant 0 : index
    %14 = vector.load %arg12[%c0_13, %c0_14] : memref<16x8xf32, #tpu.memory_space<vmem>>, vector<16x8xf32>
    tpu.vector_store %arg12[%c0_13, %c0_14], %13 {strides = array<i32>} : memref<16x8xf32, #tpu.memory_space<vmem>>, vector<16x8xf32>,
    %cst_15 = arith.constant dense<0.000000e+00> : vector<16x8xf32>
    %15 = vector.multi_reduction <add>, %12, %cst_15 [2] : vector<16x8x16xf32> to vector<16x8xf32>
    %c0_16 = arith.constant 0 : index
    %c0_17 = arith.constant 0 : index
    %16 = vector.load %arg13[%c0_16, %c0_17] : memref<16x8xf32, #tpu.memory_space<vmem>>, vector<16x8xf32>
    tpu.vector_store %arg13[%c0_16, %c0_17], %15 {strides = array<i32>} : memref<16x8xf32, #tpu.memory_space<vmem>>, vector<16x8xf32>,
    %c0_18 = arith.constant 0 : index
    %c0_19 = arith.constant 0 : index
    %17 = vector.load %arg12[%c0_18, %c0_19] : memref<16x8xf32, #tpu.memory_space<vmem>>, vector<16x8xf32>
    %c0_20 = arith.constant 0 : index
    %c0_21 = arith.constant 0 : index
    %18 = vector.load %arg13[%c0_20, %c0_21] : memref<16x8xf32, #tpu.memory_space<vmem>>, vector<16x8xf32>
    %cst_22 = arith.constant dense<0xFF800000> : vector<8xf32>
    %19 = vector.multi_reduction <maximumf>, %17, %cst_22 [0] : vector<16x8xf32> to vector<8xf32>
    %20 = vector.shape_cast %19 : vector<8xf32> to vector<1x8xf32>
    %21 = vector.broadcast %20 : vector<1x8xf32> to vector<16x8xf32>
    %22 = arith.subf %17, %21 : vector<16x8xf32>
    %23 = math.exp %22 : vector<16x8xf32>
    %cst_23 = arith.constant dense<0.000000e+00> : vector<8xf32>
    %24 = vector.multi_reduction <add>, %23, %cst_23 [0] : vector<16x8xf32> to vector<8xf32>
    %25 = vector.shape_cast %24 : vector<8xf32> to vector<1x8xf32>
    %26 = vector.broadcast %25 : vector<1x8xf32> to vector<16x8xf32>
    %27 = arith.divf %23, %26 : vector<16x8xf32>
    %cst_24 = arith.constant dense<0xFF800000> : vector<8xf32>
    %28 = vector.multi_reduction <maximumf>, %18, %cst_24 [0] : vector<16x8xf32> to vector<8xf32>
    %29 = vector.shape_cast %28 : vector<8xf32> to vector<1x8xf32>
    %30 = vector.broadcast %29 : vector<1x8xf32> to vector<16x8xf32>
    %31 = arith.subf %18, %30 : vector<16x8xf32>
    %32 = math.exp %31 : vector<16x8xf32>
    %cst_25 = arith.constant dense<0.000000e+00> : vector<8xf32>
    %33 = vector.multi_reduction <add>, %32, %cst_25 [0] : vector<16x8xf32> to vector<8xf32>
    %34 = vector.shape_cast %33 : vector<8xf32> to vector<1x8xf32>
    %35 = vector.broadcast %34 : vector<1x8xf32> to vector<16x8xf32>
    %36 = arith.divf %32, %35 : vector<16x8xf32>
    %37 = arith.addf %17, %18 : vector<16x8xf32>
    %cst_26 = arith.constant dense<0xFF800000> : vector<8xf32>
    %38 = vector.multi_reduction <maximumf>, %37, %cst_26 [0] : vector<16x8xf32> to vector<8xf32>
    %39 = vector.shape_cast %38 : vector<8xf32> to vector<1x8xf32>
    %40 = vector.broadcast %39 : vector<1x8xf32> to vector<16x8xf32>
    %41 = arith.subf %37, %40 : vector<16x8xf32>
    %42 = math.exp %41 : vector<16x8xf32>
    %cst_27 = arith.constant dense<0.000000e+00> : vector<8xf32>
    %43 = vector.multi_reduction <add>, %42, %cst_27 [0] : vector<16x8xf32> to vector<8xf32>
    %44 = vector.shape_cast %43 : vector<8xf32> to vector<1x8xf32>
    %45 = vector.broadcast %44 : vector<1x8xf32> to vector<16x8xf32>
    %46 = arith.divf %42, %45 : vector<16x8xf32>
    %47 = tpu.transpose %27, [1, 0] : vector<16x8xf32> -> vector<8x16xf32>
    %c0_28 = arith.constant 0 : index
    %c0_29 = arith.constant 0 : index
    %48 = vector.load %arg10[%c0_28, %c0_29] : memref<8x16xf32, #tpu.memory_space<vmem>>, vector<8x16xf32>
    tpu.vector_store %arg10[%c0_28, %c0_29], %47 {strides = array<i32>} : memref<8x16xf32, #tpu.memory_space<vmem>>, vector<8x16xf32>,
    %49 = tpu.transpose %36, [1, 0] : vector<16x8xf32> -> vector<8x16xf32>
    %c0_30 = arith.constant 0 : index
    %c0_31 = arith.constant 0 : index
    %50 = vector.load %arg11[%c0_30, %c0_31] : memref<8x16xf32, #tpu.memory_space<vmem>>, vector<8x16xf32>
    tpu.vector_store %arg11[%c0_30, %c0_31], %49 {strides = array<i32>} : memref<8x16xf32, #tpu.memory_space<vmem>>, vector<8x16xf32>,
    %51 = tpu.transpose %46, [1, 0] : vector<16x8xf32> -> vector<8x16xf32>
    %c0_32 = arith.constant 0 : index
    %c0_33 = arith.constant 0 : index
    %52 = vector.load %arg9[%c0_32, %c0_33] : memref<8x16xf32, #tpu.memory_space<vmem>>, vector<8x16xf32>
    tpu.vector_store %arg9[%c0_32, %c0_33], %51 {strides = array<i32>} : memref<8x16xf32, #tpu.memory_space<vmem>>, vector<8x16xf32>,
    %c0_34 = arith.constant 0 : index
    %c0_35 = arith.constant 0 : index
    %53 = vector.load %arg12[%c0_34, %c0_35] : memref<16x8xf32, #tpu.memory_space<vmem>>, vector<16x8xf32>
    tpu.vector_store %arg12[%c0_34, %c0_35], %46 {strides = array<i32>} : memref<16x8xf32, #tpu.memory_space<vmem>>, vector<16x8xf32>,
    %cst_36 = arith.constant 0.000000e+00 : f32
    %54 = vector.broadcast %cst_36 : f32 to vector<8x32xf32>
    %c0_37 = arith.constant 0 : index
    %c0_38 = arith.constant 0 : index
    %55 = vector.load %arg14[%c0_37, %c0_38] : memref<8x32xf32, #tpu.memory_space<vmem>>, vector<8x32xf32>
    tpu.vector_store %arg14[%c0_37, %c0_38], %54 {strides = array<i32>} : memref<8x32xf32, #tpu.memory_space<vmem>>, vector<8x32xf32>,
    %c0_39 = arith.constant 0 : index
    %c0_40 = arith.constant 0 : index
    %c0_41 = arith.constant 0 : index
    %56 = vector.load %arg2[%c0_39, %c0_40, %c0_41] : memref<16x8x32xf32, #tpu.memory_space<vmem>>, vector<16x8x32xf32>
    %c0_42 = arith.constant 0 : index
    %c0_43 = arith.constant 0 : index
    %57 = vector.load %arg12[%c0_42, %c0_43] : memref<16x8xf32, #tpu.memory_space<vmem>>, vector<16x8xf32>
    %c0_44 = arith.constant 0 : index
    %c0_45 = arith.constant 0 : index
    %58 = vector.load %arg14[%c0_44, %c0_45] : memref<8x32xf32, #tpu.memory_space<vmem>>, vector<8x32xf32>
    %59 = vector.shape_cast %57 : vector<16x8xf32> to vector<16x8x1xf32>
    %60 = vector.broadcast %59 : vector<16x8x1xf32> to vector<16x8x32xf32>
    %61 = arith.mulf %56, %60 : vector<16x8x32xf32>
    %cst_46 = arith.constant dense<0.000000e+00> : vector<8x32xf32>
    %62 = vector.multi_reduction <add>, %61, %cst_46 [0] : vector<16x8x32xf32> to vector<8x32xf32>
    %63 = arith.addf %58, %62 : vector<8x32xf32>
    %c0_47 = arith.constant 0 : index
    %c0_48 = arith.constant 0 : index
    %64 = vector.load %arg14[%c0_47, %c0_48] : memref<8x32xf32, #tpu.memory_space<vmem>>, vector<8x32xf32>
    tpu.vector_store %arg14[%c0_47, %c0_48], %63 {strides = array<i32>} : memref<8x32xf32, #tpu.memory_space<vmem>>, vector<8x32xf32>,
    %c0_49 = arith.constant 0 : index
    %c0_50 = arith.constant 0 : index
    %65 = vector.load %arg14[%c0_49, %c0_50] : memref<8x32xf32, #tpu.memory_space<vmem>>, vector<8x32xf32>
    %c0_51 = arith.constant 0 : index
    %c0_52 = arith.constant 0 : index
    %66 = vector.load %arg6[%c0_51, %c0_52] : memref<32x32xf32, #tpu.memory_space<vmem>>, vector<32x32xf32>
    %cst_53 = arith.constant dense<0.000000e+00> : vector<8x32xf32>
    %67 = tpu.matmul %65, %66, %cst_53 {dimension_numbers = #tpu.dot_dimension_numbers<[1], [0], [0], [1], [0, 0, 1, 1], [], []>} : vector<8x32xf32>, vector<32x32xf32>, vector<8x32xf32> -> vector<8x32xf32>
    %c0_54 = arith.constant 0 : index
    %c0_55 = arith.constant 0 : index
    %68 = vector.load %arg7[%c0_54, %c0_55] : memref<32x32xf32, #tpu.memory_space<vmem>>, vector<32x32xf32>
    %cst_56 = arith.constant dense<0.000000e+00> : vector<8x32xf32>
    %69 = tpu.matmul %0, %68, %cst_56 {dimension_numbers = #tpu.dot_dimension_numbers<[1], [0], [0], [1], [0, 0, 1, 1], [], []>} : vector<8x32xf32>, vector<32x32xf32>, vector<8x32xf32> -> vector<8x32xf32>
    %70 = arith.addf %67, %69 : vector<8x32xf32>
    %71 = math.tanh %70 : vector<8x32xf32>
    %c0_57 = arith.constant 0 : index
    %c0_58 = arith.constant 0 : index
    %72 = vector.load %arg8[%c0_57, %c0_58] : memref<8x32xf32, #tpu.memory_space<vmem>>, vector<8x32xf32>
    tpu.vector_store %arg8[%c0_57, %c0_58], %71 {strides = array<i32>} : memref<8x32xf32, #tpu.memory_space<vmem>>, vector<8x32xf32>,
    return
  }
  func.func @transform_0(%arg0: i32) -> (i32, i32) {
    %c0_i32 = arith.constant 0 : i32
    %c0_i32_0 = arith.constant 0 : i32
    return %arg0, %c0_i32 : i32, i32
  }
  func.func @transform_1(%arg0: i32) -> (i32, i32, i32) {
    %c0_i32 = arith.constant 0 : i32
    %c0_i32_0 = arith.constant 0 : i32
    %c0_i32_1 = arith.constant 0 : i32
    return %c0_i32, %arg0, %c0_i32_0 : i32, i32, i32
  }
  func.func @transform_2(%arg0: i32) -> (i32, i32, i32) {
    %c0_i32 = arith.constant 0 : i32
    %c0_i32_0 = arith.constant 0 : i32
    %c0_i32_1 = arith.constant 0 : i32
    return %c0_i32, %arg0, %c0_i32_0 : i32, i32, i32
  }
  func.func @transform_3(%arg0: i32) -> (i32, i32) {
    %c0_i32 = arith.constant 0 : i32
    %c0_i32_0 = arith.constant 0 : i32
    %c0_i32_1 = arith.constant 0 : i32
    return %c0_i32, %c0_i32_0 : i32, i32
  }
  func.func @transform_4(%arg0: i32) -> (i32, i32) {
    %c0_i32 = arith.constant 0 : i32
    %c0_i32_0 = arith.constant 0 : i32
    %c0_i32_1 = arith.constant 0 : i32
    return %c0_i32, %c0_i32_0 : i32, i32
  }
  func.func @transform_5(%arg0: i32) -> (i32, i32) {
    %c0_i32 = arith.constant 0 : i32
    %c0_i32_0 = arith.constant 0 : i32
    %c0_i32_1 = arith.constant 0 : i32
    return %c0_i32, %c0_i32_0 : i32, i32
  }
  func.func @transform_6(%arg0: i32) -> (i32, i32) {
    %c0_i32 = arith.constant 0 : i32
    %c0_i32_0 = arith.constant 0 : i32
    %c0_i32_1 = arith.constant 0 : i32
    return %c0_i32, %c0_i32_0 : i32, i32
  }
  func.func @transform_7(%arg0: i32) -> (i32, i32) {
    %c0_i32 = arith.constant 0 : i32
    %c0_i32_0 = arith.constant 0 : i32
    return %arg0, %c0_i32 : i32, i32
  }
  func.func @transform_8(%arg0: i32) -> (i32, i32) {
    %c0_i32 = arith.constant 0 : i32
    %c0_i32_0 = arith.constant 0 : i32
    return %arg0, %c0_i32 : i32, i32
  }
  func.func @transform_9(%arg0: i32) -> (i32, i32) {
    %c0_i32 = arith.constant 0 : i32
    %c0_i32_0 = arith.constant 0 : i32
    return %arg0, %c0_i32 : i32, i32
  }
  func.func @transform_10(%arg0: i32) -> (i32, i32) {
    %c0_i32 = arith.constant 0 : i32
    %c0_i32_0 = arith.constant 0 : i32
    return %arg0, %c0_i32 : i32, i32
  }
}

</mosaic_0001>

<bundles_post_ra>
// kernel: tpu_custom_call.1
= control target key start
LH: loop header
LB: loop body
LE: loop exit
PB: predicated region body
PF: predicated region fallthrough
CT: control target
= control target key end

     0   :  { %16 = vsyncpa [#allocation6], 0  ;;  %s1992_s0 = inlined_call_operand.hbm [shape: f32[8,32], index: 0, kind: input, shape index: {}]   ;;  %s1993_s1 = inlined_call_operand.hbm [shape: f32[16,8,32], index: 1, kind: input, shape index: {}]   ;;  %s1994_s2 = inlined_call_operand.hbm [shape: f32[16,8,16], index: 2, kind: input, shape index: {}]   ;;  %s1995_s3 = inlined_call_operand.vmem [shape: f32[32,32], index: 3, kind: input, shape index: {}]   ;;  %s1996_s4 = inlined_call_operand.vmem [shape: f32[32,16], index: 4, kind: input, shape index: {}]   ;;  %s1997_s5 = inlined_call_operand.vmem [shape: f32[32,32], index: 5, kind: input, shape index: {}]   ;;  %s1998_s6 = inlined_call_operand.hbm [shape: f32[32,32], index: 6, kind: input, shape index: {}]   ;;  %s1999_s7 = inlined_call_operand.hbm [shape: f32[8,32], index: 7, kind: output, shape index: {0}]   ;;  %s2000_s8 = inlined_call_operand.hbm [shape: f32[8,16], index: 8, kind: output, shape index: {1}]   ;;  %s2001_s9 = inlined_call_operand.hbm [shape: f32[8,16], index: 9, kind: output, shape index: {2}]   ;;  %s2002_s10 = inlined_call_operand.hbm [shape: f32[8,16], index: 10, kind: output, shape index: {3}]  }
   0x1   :  { %17 = vsyncpa [#allocation9], 0 }
   0x2   :  { %18 = vsyncpa [#allocation12], 0 }
   0x3   :  { %19 = vsyncpa [#allocation7], 0 }
   0x4   :  { %20 = vsyncpa [#allocation15], 0 }
   0x5   :  { %21 = vsyncpa [#allocation18], 0  ;;  %s1502_s13 = smov [#allocation8]   ;;  %s1314_s17 = scalar_lea.hbm %s1993_s1, 2048 }
   0x6   :  { %s37_s14 = sshll.u32 %s1502_s13, 4  ;;  %p1315_p0 = scmp.ne.s32.totalorder %s1993_s1, %s1314_s17  ;;  %s38_s14 = int_to_ptr.vmem [resolvable:$true] %s37_s14 }
   0x7   :  { %p1318_p1 = scmp.lt.u32.totalorder %s1314_s17, %s1993_s1 }
   0x9   :  { %p1320_p2 = pnand %p1318_p1, %p1315_p0 }
   0xb   :  { %1323 = shalt.err (!%p1320_p2)
}
   0xc   :  { %s1324_s22 = scalar_lea.vmem %s38_s14, 2048  ;;  %p1329_p4 = scmp.lt.s32.totalorder %s38_s14, %s38_s14 }
   0xd   :  { %p1325_p3 = scmp.ne.s32.totalorder %s38_s14, %s1324_s22  ;;  %p1330_p5 = scmp.lt.s32.totalorder %s1324_s22, %s1324_s22 }
   0xf   :  { %p1331_p6 = por %p1330_p5, %p1329_p4 }
  0x11   :  { %p1332_p7 = pnand %p1331_p6, %p1325_p3 }
  0x13   :  { %1335 = shalt.err (!%p1332_p7)
}
  0x14   :  { %s1503_s23 = smov 128   ;;  %s1504_s24 = smov 8  }
  0x15   :  { %43 = dma.hbm_to_vmem [thread:$0]  %s1993_s1, 2048, %s38_s14, [#allocation9], %s1503_s23, %s1503_s23, %s1504_s24  }
  0x16   :  { %s1505_s27 = smov [#allocation5]   ;;  %s1506_s29 = smov [#allocation10]  }
  0x17   :  { %s28_s28 = sshll.u32 %s1505_s27, 4  ;;  %s49_s30 = sshll.u32 %s1506_s29, 4  ;;  %s29_s28 = int_to_ptr.vmem [resolvable:$true] %s28_s28  ;;  %s50_s30 = int_to_ptr.vmem [resolvable:$true] %s49_s30 }
  0x18   :  { %s1336_s13 = scalar_lea.hbm %s1992_s0, 128 }
  0x19   :  { %p1337_p8 = scmp.ne.s32.totalorder %s1992_s0, %s1336_s13  ;;  %p1340_p9 = scmp.lt.u32.totalorder %s1336_s13, %s1992_s0 }
  0x1b   :  { %p1342_p10 = pnand %p1340_p9, %p1337_p8 }
  0x1d   :  { %1345 = shalt.err (!%p1342_p10)
}
  0x1e   :  { %s1346_s1 = scalar_lea.vmem %s29_s28, 128  ;;  %p1351_p12 = scmp.lt.s32.totalorder %s29_s28, %s29_s28 }
  0x1f   :  { %p1347_p11 = scmp.ne.s32.totalorder %s29_s28, %s1346_s1  ;;  %p1352_p13 = scmp.lt.s32.totalorder %s1346_s1, %s1346_s1 }
  0x21   :  { %p1353_p0 = por %p1352_p13, %p1351_p12 }
  0x23   :  { %p1354_p1 = pnand %p1353_p0, %p1347_p11 }
  0x25   :  { %1357 = shalt.err (!%p1354_p1)
}
  0x26   :  { %31 = dma.hbm_to_vmem [thread:$0]  %s1992_s0, 128, %s29_s28, [#allocation6]  }
  0x27   :  { %s1358_s22 = scalar_lea.hbm %s1994_s2, 2048 }
  0x28   :  { %p1359_p2 = scmp.ne.s32.totalorder %s1994_s2, %s1358_s22  ;;  %p1362_p3 = scmp.lt.u32.totalorder %s1358_s22, %s1994_s2 }
  0x2a   :  { %p1364_p4 = pnand %p1362_p3, %p1359_p2 }
  0x2c   :  { %1367 = shalt.err (!%p1364_p4)
}
  0x2d   :  { %s1368_s11 = scalar_lea.vmem %s50_s30, 2048  ;;  %p1373_p6 = scmp.lt.s32.totalorder %s50_s30, %s50_s30 }
  0x2e   :  { %p1369_p5 = scmp.ne.s32.totalorder %s50_s30, %s1368_s11  ;;  %p1374_p7 = scmp.lt.s32.totalorder %s1368_s11, %s1368_s11 }
  0x30   :  { %p1375_p8 = por %p1374_p7, %p1373_p6 }
  0x32   :  { %p1376_p9 = pnand %p1375_p8, %p1369_p5 }
  0x34   :  { %1379 = shalt.err (!%p1376_p9)
}
  0x35   :  { %55 = dma.hbm_to_vmem [thread:$0]  %s1994_s2, 2048, %s50_s30, [#allocation9], %s1503_s23, %s1503_s23, %s1504_s24  }
  0x36   :  { %s1507_s12 = smov [#allocation11]   ;;  %s1380_s17 = scalar_lea.hbm %s1998_s6, 512 }
  0x37   :  { %s67_s13 = sshll.u32 %s1507_s12, 4  ;;  %p1381_p10 = scmp.ne.s32.totalorder %s1998_s6, %s1380_s17  ;;  %s68_s13 = int_to_ptr.vmem [resolvable:$true] %s67_s13 }
  0x38   :  { %p1384_p11 = scmp.lt.u32.totalorder %s1380_s17, %s1998_s6 }
  0x3a   :  { %p1386_p12 = pnand %p1384_p11, %p1381_p10 }
  0x3c   :  { %1389 = shalt.err (!%p1386_p12)
}
  0x3d   :  { %s1390_s20 = scalar_lea.vmem %s68_s13, 512  ;;  %p1395_p0 = scmp.lt.s32.totalorder %s68_s13, %s68_s13 }
  0x3e   :  { %p1391_p13 = scmp.ne.s32.totalorder %s68_s13, %s1390_s20  ;;  %p1396_p1 = scmp.lt.s32.totalorder %s1390_s20, %s1390_s20 }
  0x40   :  { %p1397_p2 = por %p1396_p1, %p1395_p0 }
  0x42   :  { %p1398_p3 = pnand %p1397_p2, %p1391_p13 }
  0x44   :  { %1401 = shalt.err (!%p1398_p3)
}
  0x45   :  { %73 = dma.hbm_to_vmem [thread:$0]  %s1998_s6, 512, %s68_s13, [#allocation12], %s1503_s23, %s1503_s23, %s1504_s24  }
  0x46   :  { %1490 = dma.done.wait [#allocation6], 128  }
  0x47   :  { %1491 = vsyncadd [#allocation6], 4294967168 }
  0x48   :  { %1492 = dma.done.wait [#allocation9], 4096  }
  0x49   :  { %1493 = vsyncadd [#allocation9], 4294963200 }
  0x4a   :  { %1494 = dma.done.wait [#allocation12], 512  }
  0x4b   :  { %1495 = vsyncadd [#allocation12], 4294966784  ;;  %vm91_vm0 = vcmask 261120   ;;  %v1508_v0 = vmov 0.0|0.0   ;;  %vm1509_vm1 = vmmov 0   ;;  %v1510_v1 = vmov 0.0  }
  0x4c   :  { %1255 = vmatprep.subr.bf16.mxu1 %v1508_v0  ;;  %1219 = vmatprep.mubr.msk.f32.mxu1 %vm1509_vm1, %v1510_v1  ;;  %794 = vst.msk [vmem:[#allocation4] sm:$0xff] %vm91_vm0, %v1510_v1  ;;  %v87_v2 = vld [vmem:[%s1995_s3] sm:$0xff]  ;;  %v88_v3 = vld [vmem:[%s1995_s3 + $0x8] sm:$0xff]  ;;  %v89_v4 = vld [vmem:[%s1995_s3 + $0x10] sm:$0xff]  ;;  %vm459_vm2 = vcmask 130048   ;;  %vm433_vm3 = vcmask 1041409  }
  0x4d   :  { %1267 = vmatprep.subr.bf16.mxu0 %v1508_v0  ;;  %1241 = vmatprep.mubr.msk.f32.mxu0 %vm1509_vm1, %v1510_v1  ;;  %v1256_v5 = vpack.c.bf16 %v88_v3, %v87_v2  ;;  %v90_v6 = vld [vmem:[%s1995_s3 + $0x18] sm:$0xff]  ;;  %v165_v8 = vld [vmem:[%s1996_s4] sm:$0xff]  ;;  %v166_v9 = vld [vmem:[%s1996_s4 + $0x8] sm:$0xff]  ;;  %vm435_vm4 = vcmask 1042434   ;;  %vm437_vm5 = vcmask 1043459   ;;  %vm439_vm6 = vcmask 1044484  }
  0x4e   :  { %v1259_v7 = vpack.c.bf16 %v90_v6, %v89_v4  ;;  %v1654_v10 = vld [vmem:[#allocation5] sm:$0xff]  ;;  %v1262_v11 = vpack.c.bf16 %v166_v9, %v165_v8  ;;  %v167_v12 = vld [vmem:[%s1996_s4 + $0x10] sm:$0xff]  ;;  %v168_v13 = vld [vmem:[%s1996_s4 + $0x18] sm:$0xff]  ;;  %vm441_vm7 = vcmask 1045509   ;;  %vm443_vm8 = vcmask 1046534  }
  0x4f   :  { %1257 = vmatpush3.bf16.msra.mxu1 %v1256_v5  ;;  %v1265_v14 = vpack.c.bf16 %v168_v13, %v167_v12  ;;  %v1670_v15 = vld [vmem:[#allocation8 + $0x40] sm:$0xff]  ;;  %v1674_v18 = vld [vmem:[#allocation8 + $0x48] sm:$0xff]  ;;  %v1684_v27 = vld [vmem:[#allocation8 + $0x50] sm:$0xff]  ;;  %vm445_vm9 = vcmask 1047559   ;;  %vm456_vm10 = vcmask 64512  }
  0x50   :  { %1258 = vmatprep.subr.bf16.mxu1 %v1508_v0  ;;  %v1672_v16 = vld [vmem:[#allocation8] sm:$0xff]  ;;  %v1676_v19 = vld [vmem:[#allocation8 + $0x8] sm:$0xff]  ;;  %v1686_v28 = vld [vmem:[#allocation8 + $0x10] sm:$0xff] }
  0x51   :  { %v1692_v33 = vld [vmem:[#allocation8 + $0x58] sm:$0xff]  ;;  %v1702_v41 = vld [vmem:[#allocation8 + $0x60] sm:$0xff]  ;;  %v1710_v47 = vld [vmem:[#allocation8 + $0x68] sm:$0xff] }
  0x52   :  { %v1694_v34 = vld [vmem:[#allocation8 + $0x18] sm:$0xff]  ;;  %v1704_v42 = vld [vmem:[#allocation8 + $0x20] sm:$0xff]  ;;  %v1712_v48 = vld [vmem:[#allocation8 + $0x28] sm:$0xff] }
  0x53   :  { %1260 = vmatpush3.bf16.msra.mxu1 %v1259_v7  ;;  %v1718_v53 = vld [vmem:[#allocation8 + $0x70] sm:$0xff]  ;;  %v1726_v59 = vld [vmem:[#allocation8 + $0x78] sm:$0xff]  ;;  %v256_v61 = vld [vmem:[#allocation10 + $0x8] sm:$0xff] }
  0x54   :  { %1261 = vmatprep.subr.bf16.mxu1 %v1508_v0  ;;  %v1720_v54 = vld [vmem:[#allocation8 + $0x30] sm:$0xff]  ;;  %v1728_v60 = vld [vmem:[#allocation8 + $0x38] sm:$0xff]  ;;  %v255_v62 = vld [vmem:[#allocation10] sm:$0xff] }
  0x55   :  { %v264_v9 = vld [vmem:[#allocation10 + $0x48] sm:$0xff] }
  0x56   :  { %1220 = vmatmul.mubr.msk.f32.vlgmr.msra.gmra.mrb[0].mxu1 %vm91_vm0, %v1654_v10 }
  0x57   :  { %1263 = vmatpush3.bf16.msra.mxu1 %v1262_v11  ;;  %1230 = vmatprep.mubr.msk.f32.mxu1 %vm1509_vm1, %v1510_v1  ;;  %v263_v11 = vld [vmem:[#allocation10 + $0x40] sm:$0xff] }
  0x58   :  { %1264 = vmatprep.subr.bf16.mxu1 %v1508_v0 }
  0x5b   :  { %1266 = vmatpush3.bf16.msra.mxu1 %v1265_v14 }
  0x5e   :  { %1231 = vmatmul.mubr.msk.f32.vlgmr.msra.gmra.mrb[2].mxu1 %vm91_vm0, %v1654_v10 }
 0x129   :  { %v161_v17 = vpop.f32.mrb[0].mxu1 }
 0x12a   :  { %v1221_v20 = vpop.f32.mrb[1].mxu1  ;;  %v279_v21 = vmul.f32 %v1670_v15, %v161_v17  ;;  %v271_v22 = vmul.f32 %v1672_v16, %v161_v17  ;;  %v280_v25 = vmul.f32 %v1674_v18, %v161_v17  ;;  %v272_v26 = vmul.f32 %v1676_v19, %v161_v17 }
 0x12b   :  { %v281_v31 = vmul.f32 %v1684_v27, %v161_v17  ;;  %v273_v32 = vmul.f32 %v1686_v28, %v161_v17  ;;  %v282_v39 = vmul.f32 %v1692_v33, %v161_v17  ;;  %v274_v40 = vmul.f32 %v1694_v34, %v161_v17  ;;  %v265_v20 = vld [vmem:[#allocation10 + $0x50] sm:$0xff] }
 0x12c   :  { %v327_v23 = vsel %vm91_vm0, %v279_v21, 0.0  ;;  %v303_v24 = vsel %vm91_vm0, %v271_v22, 0.0  ;;  %v330_v29 = vsel %vm91_vm0, %v280_v25, 0.0  ;;  %v306_v30 = vsel %vm91_vm0, %v272_v26, 0.0  ;;  %v257_v21 = vld [vmem:[#allocation10 + $0x10] sm:$0xff]  ;;  %v266_v26 = vld [vmem:[#allocation10 + $0x58] sm:$0xff] }
 0x12d   :  { %328 = vadd.xlane.f32.xlu1 %v327_v23  ;;  %304 = vadd.xlane.f32.xlu0 %v303_v24  ;;  %v333_v37 = vsel %vm91_vm0, %v281_v31, 0.0  ;;  %v309_v38 = vsel %vm91_vm0, %v273_v32, 0.0  ;;  %v336_v43 = vsel %vm91_vm0, %v282_v39, 0.0  ;;  %v312_v44 = vsel %vm91_vm0, %v274_v40, 0.0 }
 0x12e   :  { %v283_v45 = vmul.f32 %v1702_v41, %v161_v17  ;;  %v275_v46 = vmul.f32 %v1704_v42, %v161_v17  ;;  %v284_v51 = vmul.f32 %v1710_v47, %v161_v17  ;;  %v276_v52 = vmul.f32 %v1712_v48, %v161_v17 }
 0x12f   :  { %v285_v57 = vmul.f32 %v1718_v53, %v161_v17  ;;  %v277_v58 = vmul.f32 %v1720_v54, %v161_v17  ;;  %v286_v3 = vmul.f32 %v1726_v59, %v161_v17  ;;  %v278_v4 = vmul.f32 %v1728_v60, %v161_v17 }
 0x130   :  { %v339_v49 = vsel %vm91_vm0, %v283_v45, 0.0  ;;  %v315_v50 = vsel %vm91_vm0, %v275_v46, 0.0  ;;  %v342_v55 = vsel %vm91_vm0, %v284_v51, 0.0  ;;  %v318_v56 = vsel %vm91_vm0, %v276_v52, 0.0  ;;  %v268_v45 = vld [vmem:[#allocation10 + $0x68] sm:$0xff] }
 0x131   :  { %331 = vadd.xlane.f32.xlu1 %v330_v29  ;;  %307 = vadd.xlane.f32.xlu0 %v306_v30  ;;  %v1696_v35 = vpop.f32.mrb[2].mxu1  ;;  %v345_v63 = vsel %vm91_vm0, %v285_v57, 0.0  ;;  %v321_v2 = vsel %vm91_vm0, %v277_v58, 0.0  ;;  %v348_v7 = vsel %vm91_vm0, %v286_v3, 0.0  ;;  %v324_v8 = vsel %vm91_vm0, %v278_v4, 0.0  ;;  %v258_v29 = vld [vmem:[#allocation10 + $0x18] sm:$0xff] }
 0x132   :  { %v1232_v36 = vpop.f32.mrb[3].mxu1  ;;  %v288_v5 = vmul.f32 %v256_v61, %v1696_v35  ;;  %v287_v6 = vmul.f32 %v255_v62, %v1696_v35  ;;  %v296_v14 = vmul.f32 %v264_v9, %v1696_v35  ;;  %v295_v17 = vmul.f32 %v263_v11, %v1696_v35  ;;  %v260_v46 = vld [vmem:[#allocation10 + $0x28] sm:$0xff] }
 0x133   :  { %v297_v24 = vmul.f32 %v265_v20, %v1696_v35  ;;  %v289_v25 = vmul.f32 %v257_v21, %v1696_v35  ;;  %v298_v32 = vmul.f32 %v266_v26, %v1696_v35  ;;  %v290_v36 = vmul.f32 %v258_v29, %v1696_v35 }
 0x134   :  { %v463_v12 = vsel %vm459_vm2, %v288_v5, 0.0  ;;  %v460_v13 = vsel %vm459_vm2, %v287_v6, 0.0  ;;  %v487_v22 = vsel %vm459_vm2, %v296_v14, 0.0  ;;  %v484_v23 = vsel %vm459_vm2, %v295_v17, 0.0 }
 0x135   :  { %334 = vadd.xlane.f32.xlu1 %v333_v37  ;;  %310 = vadd.xlane.f32.xlu0 %v309_v38  ;;  %v490_v30 = vsel %vm459_vm2, %v297_v24, 0.0  ;;  %v466_v31 = vsel %vm459_vm2, %v289_v25, 0.0  ;;  %v267_v37 = vld [vmem:[#allocation10 + $0x60] sm:$0xff]  ;;  %v493_v39 = vsel %vm459_vm2, %v298_v32, 0.0  ;;  %v469_v40 = vsel %vm459_vm2, %v290_v36, 0.0 }
 0x136   :  { %v259_v38 = vld [vmem:[#allocation10 + $0x20] sm:$0xff]  ;;  %v300_v51 = vmul.f32 %v268_v45, %v1696_v35  ;;  %v292_v52 = vmul.f32 %v260_v46, %v1696_v35  ;;  %v367_v20 = vlaneseq }
 0x138   :  { %v499_v57 = vsel %vm459_vm2, %v300_v51, 0.0  ;;  %v475_v58 = vsel %vm459_vm2, %v292_v52, 0.0  ;;  %v1768_v24 = vshrl.u32 %v367_v20, 7 }
 0x139   :  { %337 = vadd.xlane.f32.xlu1 %v336_v43  ;;  %313 = vadd.xlane.f32.xlu0 %v312_v44  ;;  %v299_v43 = vmul.f32 %v267_v37, %v1696_v35  ;;  %v291_v44 = vmul.f32 %v259_v38, %v1696_v35 }
 0x13d   :  { %340 = vadd.xlane.f32.xlu1 %v339_v49  ;;  %316 = vadd.xlane.f32.xlu0 %v315_v50  ;;  %v496_v49 = vsel %vm459_vm2, %v299_v43, 0.0  ;;  %v472_v50 = vsel %vm459_vm2, %v291_v44, 0.0 }
 0x141   :  { %343 = vadd.xlane.f32.xlu1 %v342_v55  ;;  %319 = vadd.xlane.f32.xlu0 %v318_v56  ;;  %v269_v55 = vld [vmem:[#allocation10 + $0x70] sm:$0xff] }
 0x142   :  { %v261_v56 = vld [vmem:[#allocation10 + $0x30] sm:$0xff]  ;;  %v301_v61 = vmul.f32 %v269_v55, %v1696_v35 }
 0x143   :  { %v293_v62 = vmul.f32 %v261_v56, %v1696_v35 }
 0x144   :  { %v502_v3 = vsel %vm459_vm2, %v301_v61, 0.0 }
 0x145   :  { %346 = vadd.xlane.f32.xlu1 %v345_v63  ;;  %322 = vadd.xlane.f32.xlu0 %v321_v2  ;;  %v270_v63 = vld [vmem:[#allocation10 + $0x78] sm:$0xff]  ;;  %v478_v4 = vsel %vm459_vm2, %v293_v62, 0.0 }
 0x146   :  { %v262_v2 = vld [vmem:[#allocation10 + $0x38] sm:$0xff]  ;;  %v302_v5 = vmul.f32 %v270_v63, %v1696_v35 }
 0x147   :  { %v294_v6 = vmul.f32 %v262_v2, %v1696_v35 }
 0x149   :  { %349 = vadd.xlane.f32.xlu1 %v348_v7  ;;  %325 = vadd.xlane.f32.xlu0 %v324_v8  ;;  %v505_v7 = vsel %vm459_vm2, %v302_v5, 0.0  ;;  %v481_v8 = vsel %vm459_vm2, %v294_v6, 0.0 }
 0x14d   :  { %464 = vadd.xlane.f32.xlu1 %v463_v12  ;;  %461 = vadd.xlane.f32.xlu0 %v460_v13 }
 0x151   :  { %488 = vadd.xlane.f32.xlu1 %v487_v22  ;;  %485 = vadd.xlane.f32.xlu0 %v484_v23  ;;  %v368_v23 = vand.u32 127, %v367_v20 }
 0x153   :  { %v1771_v26 = vsub.s32 %v368_v23, %v1768_v24 }
 0x155   :  { %491 = vadd.xlane.f32.xlu1 %v490_v30  ;;  %467 = vadd.xlane.f32.xlu0 %v466_v31 }
 0x159   :  { %494 = vadd.xlane.f32.xlu1 %v493_v39  ;;  %470 = vadd.xlane.f32.xlu0 %v469_v40 }
 0x15d   :  { %497 = vadd.xlane.f32.xlu1 %v496_v49  ;;  %473 = vadd.xlane.f32.xlu0 %v472_v50 }
 0x161   :  { %500 = vadd.xlane.f32.xlu1 %v499_v57  ;;  %476 = vadd.xlane.f32.xlu0 %v475_v58 }
 0x165   :  { %503 = vadd.xlane.f32.xlu1 %v502_v3  ;;  %479 = vadd.xlane.f32.xlu0 %v478_v4 }
 0x169   :  { %506 = vadd.xlane.f32.xlu1 %v505_v7  ;;  %482 = vadd.xlane.f32.xlu0 %v481_v8 }
 0x1ba   :  { %v329_v9 = vpop.xlane.xlu1 %328  ;;  %v305_v11 = vpop.xlane.xlu0 %304 }
 0x1bb   :  { %v404_v38 = vrot.slane %v329_v9, %v1771_v26  ;;  %v372_v39 = vrot.slane %v305_v11, %v1771_v26 }
 0x1be   :  { %v332_v12 = vpop.xlane.xlu1 %331  ;;  %v308_v13 = vpop.xlane.xlu0 %307 }
 0x1bf   :  { %v408_v31 = vrot.slane %v332_v12, %v1771_v26  ;;  %v376_v32 = vrot.slane %v308_v13, %v1771_v26 }
 0x1c1   :  { %v447_v50 = vsel %vm433_vm3, %v408_v31, %v404_v38  ;;  %v434_v51 = vsel %vm433_vm3, %v376_v32, %v372_v39 }
 0x1c2   :  { %v335_v14 = vpop.xlane.xlu1 %334  ;;  %v311_v17 = vpop.xlane.xlu0 %310 }
 0x1c3   :  { %v412_v36 = vrot.slane %v335_v14, %v1771_v26  ;;  %v380_v37 = vrot.slane %v311_v17, %v1771_v26 }
 0x1c5   :  { %v448_v56 = vsel %vm435_vm4, %v412_v36, %v447_v50  ;;  %v436_v57 = vsel %vm435_vm4, %v380_v37, %v434_v51 }
 0x1c6   :  { %v338_v21 = vpop.xlane.xlu1 %337  ;;  %v314_v22 = vpop.xlane.xlu0 %313 }
 0x1c7   :  { %v416_v40 = vrot.slane %v338_v21, %v1771_v26  ;;  %v384_v43 = vrot.slane %v314_v22, %v1771_v26 }
 0x1c9   :  { %v449_v62 = vsel %vm437_vm5, %v416_v40, %v448_v56  ;;  %v438_v63 = vsel %vm437_vm5, %v384_v43, %v436_v57 }
 0x1ca   :  { %v341_v35 = vpop.xlane.xlu1 %340  ;;  %v317_v25 = vpop.xlane.xlu0 %316 }
 0x1cb   :  { %v420_v44 = vrot.slane %v341_v35, %v1771_v26  ;;  %v388_v45 = vrot.slane %v317_v25, %v1771_v26 }
 0x1cd   :  { %v450_v2 = vsel %vm439_vm6, %v420_v44, %v449_v62  ;;  %v440_v3 = vsel %vm439_vm6, %v388_v45, %v438_v63 }
 0x1ce   :  { %v344_v29 = vpop.xlane.xlu1 %343  ;;  %v320_v30 = vpop.xlane.xlu0 %319 }
 0x1cf   :  { %v424_v52 = vrot.slane %v344_v29, %v1771_v26  ;;  %v392_v55 = vrot.slane %v320_v30, %v1771_v26 }
 0x1d1   :  { %v451_v6 = vsel %vm441_vm7, %v424_v52, %v450_v2  ;;  %v442_v7 = vsel %vm441_vm7, %v392_v55, %v440_v3 }
 0x1d2   :  { %v347_v46 = vpop.xlane.xlu1 %346  ;;  %v323_v49 = vpop.xlane.xlu0 %322 }
 0x1d3   :  { %v428_v58 = vrot.slane %v347_v46, %v1771_v26  ;;  %v396_v61 = vrot.slane %v323_v49, %v1771_v26 }
 0x1d5   :  { %v452_v11 = vsel %vm443_vm8, %v428_v58, %v451_v6  ;;  %v444_v12 = vsel %vm443_vm8, %v396_v61, %v442_v7 }
 0x1d6   :  { %v350_v4 = vpop.xlane.xlu1 %349  ;;  %v326_v5 = vpop.xlane.xlu0 %325 }
 0x1d7   :  { %v432_v8 = vrot.slane %v350_v4, %v1771_v26  ;;  %v400_v9 = vrot.slane %v326_v5, %v1771_v26 }
 0x1d9   :  { %v453_v13 = vsel %vm445_vm9, %v432_v8, %v452_v11  ;;  %v446_v14 = vsel %vm445_vm9, %v400_v9, %v444_v12 }
 0x1da   :  { %458 = vst.msk [vmem:[#allocation2 + $0x8] sm:$0xff] %vm456_vm10, %v453_v13  ;;  %457 = vst.msk [vmem:[#allocation2] sm:$0xff] %vm456_vm10, %v446_v14  ;;  %v465_v17 = vpop.xlane.xlu1 %464  ;;  %v462_v20 = vpop.xlane.xlu0 %461 }
 0x1db   :  { %v531_v37 = vrot.slane %v465_v17, %v1771_v26  ;;  %v527_v38 = vrot.slane %v462_v20, %v1771_v26 }
 0x1dd   :  { %v588_v55 = vsel %vm433_vm3, %v531_v37, %v527_v38 }
 0x1de   :  { %v489_v21 = vpop.xlane.xlu1 %488  ;;  %v486_v22 = vpop.xlane.xlu0 %485 }
 0x1df   :  { %v563_v39 = vrot.slane %v489_v21, %v1771_v26  ;;  %v559_v40 = vrot.slane %v486_v22, %v1771_v26 }
 0x1e1   :  { %v595_v56 = vsel %vm433_vm3, %v563_v39, %v559_v40  ;;  %v1837_v22 = vld [vmem:[#allocation2 + $0x8] sm:$0xff] }
 0x1e2   :  { %v492_v23 = vpop.xlane.xlu1 %491  ;;  %v468_v35 = vpop.xlane.xlu0 %467 }
 0x1e3   :  { %v567_v43 = vrot.slane %v492_v23, %v1771_v26  ;;  %v535_v44 = vrot.slane %v468_v35, %v1771_v26  ;;  %v1839_v23 = vld [vmem:[#allocation2] sm:$0xff] }
 0x1e5   :  { %v596_v61 = vsel %vm435_vm4, %v567_v43, %v595_v56  ;;  %v589_v62 = vsel %vm435_vm4, %v535_v44, %v588_v55 }
 0x1e6   :  { %v495_v25 = vpop.xlane.xlu1 %494  ;;  %v471_v29 = vpop.xlane.xlu0 %470 }
 0x1e7   :  { %v571_v45 = vrot.slane %v495_v25, %v1771_v26  ;;  %v539_v46 = vrot.slane %v471_v29, %v1771_v26 }
 0x1e9   :  { %v597_v3 = vsel %vm437_vm5, %v571_v45, %v596_v61  ;;  %v590_v4 = vsel %vm437_vm5, %v539_v46, %v589_v62 }
 0x1ea   :  { %v498_v30 = vpop.xlane.xlu1 %497  ;;  %v474_v31 = vpop.xlane.xlu0 %473 }
 0x1eb   :  { %v575_v49 = vrot.slane %v498_v30, %v1771_v26  ;;  %v543_v50 = vrot.slane %v474_v31, %v1771_v26 }
 0x1ed   :  { %v598_v5 = vsel %vm439_vm6, %v575_v49, %v597_v3  ;;  %v591_v6 = vsel %vm439_vm6, %v543_v50, %v590_v4 }
 0x1ee   :  { %v501_v32 = vpop.xlane.xlu1 %500  ;;  %v477_v36 = vpop.xlane.xlu0 %476 }
 0x1ef   :  { %v579_v57 = vrot.slane %v501_v32, %v1771_v26  ;;  %v547_v58 = vrot.slane %v477_v36, %v1771_v26 }
 0x1f1   :  { %v599_v9 = vsel %vm441_vm7, %v579_v57, %v598_v5  ;;  %v592_v11 = vsel %vm441_vm7, %v547_v58, %v591_v6  ;;  %v610_v5 = vsel %vm456_vm10, %v1839_v23, -inf  ;;  %v611_v6 = vsel %vm456_vm10, %v1837_v22, -inf }
 0x1f2   :  { %v504_v51 = vpop.xlane.xlu1 %503  ;;  %v480_v52 = vpop.xlane.xlu0 %479 }
 0x1f3   :  { %v583_v63 = vrot.slane %v504_v51, %v1771_v26  ;;  %v551_v2 = vrot.slane %v480_v52, %v1771_v26 }
 0x1f5   :  { %v600_v14 = vsel %vm443_vm8, %v583_v63, %v599_v9  ;;  %v593_v17 = vsel %vm443_vm8, %v551_v2, %v592_v11 }
 0x1f6   :  { %v507_v7 = vpop.xlane.xlu1 %506  ;;  %v483_v8 = vpop.xlane.xlu0 %482 }
 0x1f7   :  { %v587_v12 = vrot.slane %v507_v7, %v1771_v26  ;;  %v555_v13 = vrot.slane %v483_v8, %v1771_v26  ;;  %v612_v7 = vmax.f32 %v610_v5, %v611_v6 }
 0x1f9   :  { %v601_v20 = vsel %vm445_vm9, %v587_v12, %v600_v14  ;;  %v594_v21 = vsel %vm445_vm9, %v555_v13, %v593_v17 }
 0x1fa   :  { %605 = vst.msk [vmem:[#allocation3 + $0x8] sm:$0xff] %vm456_vm10, %v601_v20  ;;  %604 = vst.msk [vmem:[#allocation3] sm:$0xff] %vm456_vm10, %v594_v21  ;;  %v613_v20 = vrot.slane %v612_v7, 4 }
 0x201   :  { %v609_v35 = vld [vmem:[#allocation3 + $0x8] sm:$0xff]  ;;  %v608_v25 = vld [vmem:[#allocation3] sm:$0xff] }
 0x202   :  { %v665_v26 = vadd.f32 %v609_v35, %v1837_v22  ;;  %v664_v29 = vadd.f32 %v608_v25, %v1839_v23  ;;  %v637_v30 = vsel %vm456_vm10, %v608_v25, -inf  ;;  %v638_v31 = vsel %vm456_vm10, %v609_v35, -inf }
 0x203   :  { %v639_v37 = vmax.f32 %v637_v30, %v638_v31 }
 0x204   :  { %v667_v32 = vsel %vm456_vm10, %v665_v26, -inf  ;;  %v666_v36 = vsel %vm456_vm10, %v664_v29, -inf }
 0x205   :  { %v668_v38 = vmax.f32 %v666_v36, %v667_v32  ;;  %v640_v39 = vrot.slane %v639_v37, 4 }
 0x207   :  { %v669_v40 = vrot.slane %v668_v38, 4  ;;  %v641_v43 = vmax.f32 %v639_v37, %v640_v39 }
 0x209   :  { %v670_v44 = vmax.f32 %v668_v38, %v669_v40  ;;  %v642_v45 = vrot.slane %v641_v43, 2 }
 0x20b   :  { %v671_v46 = vrot.slane %v670_v44, 2  ;;  %v643_v49 = vmax.f32 %v641_v43, %v642_v45 }
 0x20d   :  { %v672_v50 = vmax.f32 %v670_v44, %v671_v46  ;;  %v644_v51 = vrot.slane %v643_v49, 1 }
 0x20f   :  { %v673_v52 = vrot.slane %v672_v50, 1  ;;  %v645_v55 = vmax.f32 %v643_v49, %v644_v51 }
 0x211   :  { %v674_v56 = vmax.f32 %v672_v50, %v673_v52  ;;  %v646_v57 = vsub.f32 %v608_v25, %v645_v55  ;;  %v647_v58 = vsub.f32 %v609_v35, %v645_v55 }
 0x213   :  { %v675_v61 = vsub.f32 %v664_v29, %v674_v56  ;;  %v676_v62 = vsub.f32 %v665_v26, %v674_v56  ;;  %v648_v63 = vmul.f32 1.442695, %v646_v57  ;;  %v650_v4 = vmul.f32 1.442695, %v647_v58 }
 0x214   :  { %v614_v29 = vmax.f32 %v612_v7, %v613_v20  ;;  %v830_v7 = vsub.s32 2, %v1768_v24 }
 0x215   :  { %v677_v2 = vmul.f32 1.442695, %v675_v61  ;;  %v679_v3 = vmul.f32 1.442695, %v676_v62  ;;  %1294 = vpow2.f32 %v648_v63 }
 0x216   :  { %v615_v37 = vrot.slane %v614_v29, 2 }
 0x217   :  { %1296 = vpow2.f32 %v677_v2 }
 0x218   :  { %1298 = vpow2.f32 %v679_v3  ;;  %v616_v44 = vmax.f32 %v614_v29, %v615_v37  ;;  %v823_v3 = vsub.s32 1, %v1768_v24 }
 0x219   :  { %1300 = vpow2.f32 %v650_v4 }
 0x21a   :  { %v617_v50 = vrot.slane %v616_v44, 1 }
 0x21c   :  { %v618_v51 = vmax.f32 %v616_v44, %v617_v50  ;;  %v980_v44 = vld [vmem:[#allocation11] sm:$0xff] }
 0x21e   :  { %v619_v52 = vsub.f32 %v1839_v23, %v618_v51  ;;  %v620_v56 = vsub.f32 %v1837_v22, %v618_v51  ;;  %v816_v22 = vsub.s32 0, %v1768_v24 }
 0x21f   :  { %v1295_v8 = vpop.eup %1294 }
 0x220   :  { %v652_v13 = vsel %vm456_vm10, %v1295_v8, 0.0  ;;  %v621_v2 = vmul.f32 1.442695, %v619_v52  ;;  %v623_v23 = vmul.f32 1.442695, %v620_v56  ;;  %v982_v52 = vld [vmem:[#allocation11 + $0x10] sm:$0xff] }
 0x221   :  { %v1297_v9 = vpop.eup %1296 }
 0x222   :  { %v1299_v11 = vpop.eup %1298  ;;  %v681_v12 = vsel %vm456_vm10, %v1297_v9, 0.0 }
 0x223   :  { %v1301_v14 = vpop.eup %1300  ;;  %v682_v17 = vsel %vm456_vm10, %v1299_v11, 0.0 }
 0x224   :  { %v683_v21 = vadd.f32 %v682_v17, %v681_v12  ;;  %v653_v35 = vsel %vm456_vm10, %v1301_v14, 0.0  ;;  %v837_v12 = vsub.s32 3, %v1768_v24 }
 0x225   :  { %v654_v25 = vadd.f32 %v653_v35, %v652_v13  ;;  %v858_v13 = vsub.s32 6, %v1768_v24  ;;  %v851_v35 = vsub.s32 5, %v1768_v24 }
 0x226   :  { %v684_v26 = vrot.slane %v683_v21, 4 }
 0x227   :  { %v655_v30 = vrot.slane %v654_v25, 4 }
 0x228   :  { %v685_v31 = vadd.f32 %v684_v26, %v683_v21 }
 0x229   :  { %v656_v32 = vadd.f32 %v655_v30, %v654_v25 }
 0x22a   :  { %v686_v36 = vrot.slane %v685_v31, 2 }
 0x22b   :  { %v657_v38 = vrot.slane %v656_v32, 2 }
 0x22c   :  { %v687_v39 = vadd.f32 %v686_v36, %v685_v31 }
 0x22d   :  { %v658_v40 = vadd.f32 %v657_v38, %v656_v32  ;;  %v865_v32 = vsub.s32 7, %v1768_v24 }
 0x22e   :  { %v688_v43 = vrot.slane %v687_v39, 1 }
 0x22f   :  { %v659_v45 = vrot.slane %v658_v40, 1 }
 0x230   :  { %v689_v46 = vadd.f32 %v688_v43, %v687_v39 }
 0x231   :  { %v660_v49 = vadd.f32 %v659_v45, %v658_v40  ;;  %v981_v45 = vld [vmem:[#allocation11 + $0x8] sm:$0xff] }
 0x232   :  { %1302 = vrcp.f32 %v689_v46 }
 0x233   :  { %1304 = vrcp.f32 %v660_v49  ;;  %v1268_v49 = vpack.c.bf16 %v981_v45, %v980_v44 }
 0x234   :  { %1306 = vpow2.f32 %v621_v2  ;;  %v976_v2 = vld [vmem:[%s1997_s5] sm:$0xff] }
 0x235   :  { %1308 = vpow2.f32 %v623_v23  ;;  %1269 = vmatpush3.bf16.msra.mxu0 %v1268_v49  ;;  %v977_v23 = vld [vmem:[%s1997_s5 + $0x8] sm:$0xff] }
 0x236   :  { %1270 = vmatprep.subr.bf16.mxu0 %v1508_v0 }
 0x23c   :  { %v1303_v55 = vpop.eup %1302 }
 0x23d   :  { %v1305_v57 = vpop.eup %1304  ;;  %v1857_v58 = vmul.f32 %v1303_v55, %v1297_v9  ;;  %v1859_v61 = vmul.f32 %v1303_v55, %v1299_v11  ;;  %v983_v55 = vld [vmem:[#allocation11 + $0x18] sm:$0xff] }
 0x23e   :  { %v1861_v62 = vmul.f32 %v1305_v57, %v1295_v8  ;;  %v1863_v63 = vmul.f32 %v1305_v57, %v1301_v14  ;;  %v844_v8 = vsub.s32 4, %v1768_v24  ;;  %v1875_v14 = vpop.eup %1306  ;;  %v1271_v56 = vpack.c.bf16 %v983_v55, %v982_v52 }
 0x23f   :  { %792 = vst.msk [vmem:[#allocation2] sm:$0xff] %vm456_vm10, %v1857_v58  ;;  %793 = vst.msk [vmem:[#allocation2 + $0x8] sm:$0xff] %vm456_vm10, %v1859_v61  ;;  %v1309_v17 = vpop.eup %1308  ;;  %v625_v26 = vsel %vm456_vm10, %v1875_v14, 0.0 }
 0x240   :  { %v626_v29 = vsel %vm456_vm10, %v1309_v17, 0.0  ;;  %1272 = vmatpush3.bf16.msra.mxu0 %v1271_v56 }
 0x241   :  { %v627_v36 = vadd.f32 %v626_v29, %v625_v26  ;;  %1273 = vmatprep.subr.bf16.mxu0 %v1508_v0 }
 0x243   :  { %v628_v39 = vrot.slane %v627_v36, 4  ;;  %1242 = vmatmul.mubr.msk.f32.vlgmr.msra.gmra.mrb[0].mxu0 %vm91_vm0, %v1654_v10 }
 0x244   :  { %1252 = vmatprep.mubr.msk.f32.mxu0 %vm1509_vm1, %v1510_v1 }
 0x245   :  { %v629_v46 = vadd.f32 %v628_v39, %v627_v36 }
 0x246   :  { %v811_v4 = vld [vmem:[#allocation2] sm:$0xff]  ;;  %v812_v25 = vld [vmem:[#allocation2 + $0x8] sm:$0xff] }
 0x247   :  { %v824_v5 = vrot.slane %v811_v4, %v823_v3  ;;  %v817_v6 = vrot.slane %v811_v4, %v816_v22  ;;  %v831_v9 = vrot.slane %v811_v4, %v830_v7  ;;  %v845_v11 = vrot.slane %v811_v4, %v844_v8 }
 0x248   :  { %v838_v20 = vrot.slane %v811_v4, %v837_v12  ;;  %v859_v21 = vrot.slane %v811_v4, %v858_v13  ;;  %v852_v30 = vrot.slane %v811_v4, %v851_v35  ;;  %v873_v31 = vrot.slane %v812_v25, %v816_v22 }
 0x249   :  { %826 = vbcast.lane.b32.xlu1 %v824_v5, 256  ;;  %819 = vbcast.lane.b32.xlu0 %v817_v6, 256  ;;  %v866_v37 = vrot.slane %v811_v4, %v865_v32  ;;  %v887_v38 = vrot.slane %v812_v25, %v830_v7  ;;  %v880_v40 = vrot.slane %v812_v25, %v823_v3  ;;  %v630_v24 = vrot.slane %v629_v46, 2  ;;  %v978_v4 = vld [vmem:[%s1997_s5 + $0x10] sm:$0xff]  ;;  %v979_v5 = vld [vmem:[%s1997_s5 + $0x18] sm:$0xff]  ;;  %s1511_s5 = smov [#allocation14]  }
 0x24a   :  { %v901_v43 = vrot.slane %v812_v25, %v844_v8  ;;  %v894_v50 = vrot.slane %v812_v25, %v837_v12  ;;  %v915_v51 = vrot.slane %v812_v25, %v858_v13  ;;  %v908_v57 = vrot.slane %v812_v25, %v851_v35  ;;  %s1145_s2 = sshll.u32 %s1511_s5, 4  ;;  %s1146_s2 = int_to_ptr.vmem [resolvable:$true] %s1145_s2 }
 0x24b   :  { %v631_v3 = vadd.f32 %v630_v24, %v629_v46  ;;  %v1274_v22 = vpack.c.bf16 %v977_v23, %v976_v2  ;;  %v922_v6 = vrot.slane %v812_v25, %v865_v32  ;;  %v1277_v8 = vpack.c.bf16 %v979_v5, %v978_v4  ;;  %s1402_s30 = scalar_lea.vmem %s1146_s2, 128  ;;  %p1407_p5 = scmp.lt.s32.totalorder %s1146_s2, %s1146_s2 }
 0x24c   :  { %p1403_p4 = scmp.ne.s32.totalorder %s1146_s2, %s1402_s30  ;;  %p1408_p6 = scmp.lt.s32.totalorder %s1402_s30, %s1402_s30 }
 0x24d   :  { %833 = vbcast.lane.b32.xlu1 %v831_v9, 256  ;;  %847 = vbcast.lane.b32.xlu0 %v845_v11, 256  ;;  %v632_v7 = vrot.slane %v631_v3, 1 }
 0x24e   :  { %1275 = vmatpush3.bf16.msra.mxu0 %v1274_v22  ;;  %p1409_p7 = por %p1408_p6, %p1407_p5 }
 0x24f   :  { %1276 = vmatprep.subr.bf16.mxu0 %v1508_v0  ;;  %v633_v9 = vadd.f32 %v632_v7, %v631_v3 }
 0x250   :  { %p1410_p8 = pnand %p1409_p7, %p1403_p4 }
 0x251   :  { %840 = vbcast.lane.b32.xlu1 %v838_v20, 256  ;;  %861 = vbcast.lane.b32.xlu0 %v859_v21, 256  ;;  %1310 = vrcp.f32 %v633_v9 }
 0x252   :  { %1278 = vmatpush3.bf16.msra.mxu0 %v1277_v8 }
 0x255   :  { %854 = vbcast.lane.b32.xlu1 %v852_v30, 256  ;;  %875 = vbcast.lane.b32.xlu0 %v873_v31, 256 }
 0x259   :  { %868 = vbcast.lane.b32.xlu1 %v866_v37, 256  ;;  %889 = vbcast.lane.b32.xlu0 %v887_v38, 256 }
 0x25b   :  { %v1311_v11 = vpop.eup %1310 }
 0x25c   :  { %v635_v12 = vmul.f32 %v1311_v11, %v1875_v14  ;;  %v636_v13 = vmul.f32 %v1311_v11, %v1309_v17 }
 0x25d   :  { %882 = vbcast.lane.b32.xlu1 %v880_v40, 256  ;;  %903 = vbcast.lane.b32.xlu0 %v901_v43, 256 }
 0x261   :  { %896 = vbcast.lane.b32.xlu1 %v894_v50, 256  ;;  %917 = vbcast.lane.b32.xlu0 %v915_v51, 256 }
 0x265   :  { %910 = vbcast.lane.b32.xlu1 %v908_v57, 256 }
 0x269   :  { %924 = vbcast.lane.b32.xlu1 %v922_v6, 256 }
 0x27f   :  { %693 = vxpose.xlu0.b32.start [1/2] (short) (narrow) %v635_v12, 8 }
 0x283   :  { %694 = vxpose.xlu0.b32.end [2/2] (short) (narrow) %v636_v13, 8 }
 0x287   :  { %726 = vxpose.xlu0.b32.start [1/2] (short) (narrow) %v1861_v62, 8 }
 0x28b   :  { %727 = vxpose.xlu0.b32.end [2/2] (short) (narrow) %v1863_v63, 8 }
 0x292   :  { %759 = vxpose.xlu1.b32.start [1/2] (short) (narrow) %v1857_v58, 8 }
 0x296   :  { %760 = vxpose.xlu1.b32.end [2/2] (short) (narrow) %v1859_v61, 8 }
 0x2bb   :  { %v827_v1 = vpop.permute.xlu1 %826  ;;  %v820_v10 = vpop.permute.xlu0 %819 }
 0x2bc   :  { %v927_v0 = vmul.f32 %v827_v1, %v1676_v19  ;;  %v926_v20 = vmul.f32 %v820_v10, %v1672_v16  ;;  %v813_v1 = vld [vmem:[#allocation4] sm:$0xff] }
 0x2be   :  { %v943_v14 = vsel %vm91_vm0, %v927_v0, 0.0  ;;  %v942_v17 = vsel %vm91_vm0, %v926_v20, 0.0 }
 0x2bf   :  { %v834_v21 = vpop.permute.xlu1 %833  ;;  %v848_v35 = vpop.permute.xlu0 %847  ;;  %v944_v25 = vadd.f32 %v943_v14, %v942_v17 }
 0x2c0   :  { %v928_v62 = vmul.f32 %v834_v21, %v1686_v28  ;;  %v930_v61 = vmul.f32 %v848_v35, %v1704_v42 }
 0x2c2   :  { %v945_v63 = vsel %vm91_vm0, %v928_v62, 0.0  ;;  %v949_v36 = vsel %vm91_vm0, %v930_v61, 0.0 }
 0x2c3   :  { %v841_v58 = vpop.permute.xlu1 %840  ;;  %v862_v26 = vpop.permute.xlu0 %861  ;;  %v946_v19 = vadd.f32 %v945_v63, %v944_v25 }
 0x2c4   :  { %v929_v29 = vmul.f32 %v841_v58, %v1694_v34  ;;  %v932_v37 = vmul.f32 %v862_v26, %v1720_v54 }
 0x2c6   :  { %v947_v16 = vsel %vm91_vm0, %v929_v29, 0.0  ;;  %v953_v34 = vsel %vm91_vm0, %v932_v37, 0.0 }
 0x2c7   :  { %v948_v30 = vadd.f32 %v947_v16, %v946_v19  ;;  %v855_v31 = vpop.permute.xlu1 %854  ;;  %v876_v32 = vpop.permute.xlu0 %875 }
 0x2c8   :  { %v931_v28 = vmul.f32 %v855_v31, %v1712_v48  ;;  %v934_v44 = vmul.f32 %v876_v32, %v1670_v15 }
 0x2c9   :  { %v950_v38 = vadd.f32 %v949_v36, %v948_v30 }
 0x2ca   :  { %v951_v39 = vsel %vm91_vm0, %v931_v28, 0.0  ;;  %v957_v48 = vsel %vm91_vm0, %v934_v44, 0.0 }
 0x2cb   :  { %v952_v40 = vadd.f32 %v951_v39, %v950_v38  ;;  %v869_v43 = vpop.permute.xlu1 %868  ;;  %v890_v42 = vpop.permute.xlu0 %889 }
 0x2cc   :  { %v933_v45 = vmul.f32 %v869_v43, %v1728_v60  ;;  %v936_v24 = vmul.f32 %v890_v42, %v1684_v27 }
 0x2cd   :  { %v954_v46 = vadd.f32 %v953_v34, %v952_v40 }
 0x2ce   :  { %v955_v49 = vsel %vm91_vm0, %v933_v45, 0.0  ;;  %v961_v15 = vsel %vm91_vm0, %v936_v24, 0.0 }
 0x2cf   :  { %v956_v50 = vadd.f32 %v955_v49, %v954_v46  ;;  %v883_v51 = vpop.permute.xlu1 %882  ;;  %v904_v54 = vpop.permute.xlu0 %903 }
 0x2d0   :  { %v935_v52 = vmul.f32 %v883_v51, %v1674_v18  ;;  %v938_v60 = vmul.f32 %v904_v54, %v1702_v41 }
 0x2d1   :  { %v958_v55 = vadd.f32 %v957_v48, %v956_v50 }
 0x2d2   :  { %v959_v56 = vsel %vm91_vm0, %v935_v52, 0.0  ;;  %v965_v27 = vsel %vm91_vm0, %v938_v60, 0.0 }
 0x2d3   :  { %v960_v57 = vadd.f32 %v959_v56, %v958_v55  ;;  %v897_v2 = vpop.permute.xlu1 %896  ;;  %v918_v22 = vpop.permute.xlu0 %917 }
 0x2d4   :  { %v937_v23 = vmul.f32 %v897_v2, %v1692_v33  ;;  %v940_v18 = vmul.f32 %v918_v22, %v1718_v53 }
 0x2d5   :  { %v962_v3 = vadd.f32 %v961_v15, %v960_v57 }
 0x2d6   :  { %v963_v4 = vsel %vm91_vm0, %v937_v23, 0.0  ;;  %v969_v41 = vsel %vm91_vm0, %v940_v18, 0.0 }
 0x2d7   :  { %v964_v5 = vadd.f32 %v963_v4, %v962_v3  ;;  %v911_v6 = vpop.permute.xlu1 %910 }
 0x2d8   :  { %v939_v7 = vmul.f32 %v911_v6, %v1710_v47 }
 0x2d9   :  { %v966_v8 = vadd.f32 %v965_v27, %v964_v5 }
 0x2da   :  { %v967_v9 = vsel %vm91_vm0, %v939_v7, 0.0 }
 0x2db   :  { %v968_v11 = vadd.f32 %v967_v9, %v966_v8  ;;  %v925_v12 = vpop.permute.xlu1 %924 }
 0x2dc   :  { %v941_v33 = vmul.f32 %v925_v12, %v1726_v59 }
 0x2dd   :  { %v970_v13 = vadd.f32 %v969_v41, %v968_v11 }
 0x2de   :  { %v971_v10 = vsel %vm91_vm0, %v941_v33, 0.0 }
 0x2df   :  { %v972_v0 = vadd.f32 %v971_v10, %v970_v13 }
 0x2e1   :  { %v973_v20 = vadd.f32 %v972_v0, %v813_v1 }
 0x2e3   :  { %974 = vst.msk [vmem:[#allocation4] sm:$0xff] %vm91_vm0, %v973_v20 }
 0x2ea   :  { %v975_v53 = vld [vmem:[#allocation4] sm:$0xff] }
 0x2eb   :  { %1253 = vmatmul.mubr.msk.f32.vlgmr.msra.gmra.mrb[0].mxu0 %vm91_vm0, %v975_v53 }
 0x2ff   :  { %v709_v47 = vpop.trf.xlu0 }
 0x300   :  { %725 = vst.msk [vmem:[#allocation16] sm:$0xff] %vm459_vm2, %v709_v47 }
 0x307   :  { %v742_v59 = vpop.trf.xlu0 }
 0x312   :  { %v775_v21 = vpop.trf.xlu1 }
 0x313   :  { %791 = vst.msk [vmem:[#allocation14] sm:$0xff] %vm459_vm2, %v775_v21 }
 0x314   :  { %1413 = shalt.err (!%p1410_p8)
}
 0x315   :  { %s1414_s24 = scalar_lea.hbm %s2000_s8, 128 }
 0x316   :  { %p1415_p9 = scmp.ne.s32.totalorder %s2000_s8, %s1414_s24  ;;  %p1418_p10 = scmp.lt.u32.totalorder %s1414_s24, %s2000_s8 }
 0x318   :  { %p1420_p11 = pnand %p1418_p10, %p1415_p9 }
 0x31a   :  { %1423 = shalt.err (!%p1420_p11)
}
 0x31b   :  { %1148 = dma.vmem_to_hbm [thread:$0]  %s1146_s2, 128, %s2000_s8, [#allocation15]   ;;  %758 = vst.msk [vmem:[#allocation17] sm:$0xff] %vm459_vm2, %v742_v59 }
 0x31c   :  { %s1512_s11 = smov [#allocation16]   ;;  %s1513_s28 = smov [#allocation17]  }
 0x31d   :  { %s1155_s0 = sshll.u32 %s1512_s11, 4  ;;  %s1165_s12 = sshll.u32 %s1513_s28, 4  ;;  %s1156_s0 = int_to_ptr.vmem [resolvable:$true] %s1155_s0  ;;  %s1166_s12 = int_to_ptr.vmem [resolvable:$true] %s1165_s12 }
 0x31e   :  { %s1424_s3 = scalar_lea.vmem %s1156_s0, 128  ;;  %p1429_p13 = scmp.lt.s32.totalorder %s1156_s0, %s1156_s0 }
 0x31f   :  { %p1425_p12 = scmp.ne.s32.totalorder %s1156_s0, %s1424_s3  ;;  %p1430_p0 = scmp.lt.s32.totalorder %s1424_s3, %s1424_s3 }
 0x321   :  { %p1431_p1 = por %p1430_p0, %p1429_p13 }
 0x323   :  { %p1432_p2 = pnand %p1431_p1, %p1425_p12 }
 0x325   :  { %1435 = shalt.err (!%p1432_p2)
}
 0x326   :  { %s1436_s4 = scalar_lea.hbm %s2001_s9, 128 }
 0x327   :  { %p1437_p3 = scmp.ne.s32.totalorder %s2001_s9, %s1436_s4  ;;  %p1440_p4 = scmp.lt.u32.totalorder %s1436_s4, %s2001_s9 }
 0x329   :  { %p1442_p5 = pnand %p1440_p4, %p1437_p3 }
 0x32b   :  { %1445 = shalt.err (!%p1442_p5)
}
 0x32c   :  { %1158 = dma.vmem_to_hbm [thread:$0]  %s1156_s0, 128, %s2001_s9, [#allocation15]  }
 0x32d   :  { %s1446_s19 = scalar_lea.vmem %s1166_s12, 128  ;;  %p1451_p7 = scmp.lt.s32.totalorder %s1166_s12, %s1166_s12 }
 0x32e   :  { %p1447_p6 = scmp.ne.s32.totalorder %s1166_s12, %s1446_s19  ;;  %p1452_p8 = scmp.lt.s32.totalorder %s1446_s19, %s1446_s19 }
 0x330   :  { %p1453_p9 = por %p1452_p8, %p1451_p7 }
 0x332   :  { %p1454_p10 = pnand %p1453_p9, %p1447_p6 }
 0x334   :  { %1457 = shalt.err (!%p1454_p10)
}
 0x335   :  { %s1458_s2 = scalar_lea.hbm %s2002_s10, 128 }
 0x336   :  { %p1459_p11 = scmp.ne.s32.totalorder %s2002_s10, %s1458_s2  ;;  %p1462_p12 = scmp.lt.u32.totalorder %s1458_s2, %s2002_s10 }
 0x338   :  { %p1464_p13 = pnand %p1462_p12, %p1459_p11 }
 0x33a   :  { %1467 = shalt.err (!%p1464_p13)
}
 0x33b   :  { %1168 = dma.vmem_to_hbm [thread:$0]  %s1166_s12, 128, %s2002_s10, [#allocation18]  }
 0x33c   :  { %s1514_s22 = smov [#allocation13]  }
 0x33d   :  { %s1135_s25 = sshll.u32 %s1514_s22, 4  ;;  %s1136_s25 = int_to_ptr.vmem [resolvable:$true] %s1135_s25 }
 0x33e   :  { %s1468_s26 = scalar_lea.vmem %s1136_s25, 128  ;;  %p1473_p1 = scmp.lt.s32.totalorder %s1136_s25, %s1136_s25 }
 0x33f   :  { %p1469_p0 = scmp.ne.s32.totalorder %s1136_s25, %s1468_s26  ;;  %p1474_p2 = scmp.lt.s32.totalorder %s1468_s26, %s1468_s26 }
 0x341   :  { %p1475_p3 = por %p1474_p2, %p1473_p1 }
 0x343   :  { %p1476_p4 = pnand %p1475_p3, %p1469_p0 }
 0x3be   :  { %v1123_v35 = vpop.f32.mrb[0].mxu0 }
 0x3bf   :  { %1312 = vtanh.f32 %v1123_v35  ;;  %v1254_v14 = vpop.f32.mrb[1].mxu0 }
 0x3c9   :  { %v1313_v17 = vpop.eup %1312 }
 0x3ca   :  { %1128 = vst.msk [vmem:[#allocation13] sm:$0xff] %vm91_vm0, %v1313_v17 }
 0x3cb   :  { %1479 = shalt.err (!%p1476_p4)
}
 0x3cc   :  { %s1480_s10 = scalar_lea.hbm %s1999_s7, 128 }
 0x3cd   :  { %p1481_p5 = scmp.ne.s32.totalorder %s1999_s7, %s1480_s10  ;;  %p1484_p6 = scmp.lt.u32.totalorder %s1480_s10, %s1999_s7 }
 0x3cf   :  { %p1486_p7 = pnand %p1484_p6, %p1481_p5 }
 0x3d1   :  { %1489 = shalt.err (!%p1486_p7)
}
 0x3d2   :  { %1138 = dma.vmem_to_hbm [thread:$0]  %s1136_s25, 128, %s1999_s7, [#allocation7]  }
 0x3d3   :  { %1496 = dma.done.wait [#allocation7], 128  }
 0x3d4   :  { %1497 = vsyncadd [#allocation7], 4294967168 }
 0x3d5   :  { %1498 = dma.done.wait [#allocation15], 256  }
 0x3d6   :  { %1499 = vsyncadd [#allocation15], 4294967040 }
 0x3d7   :  { %1500 = dma.done.wait [#allocation18], 128  }
 0x3d8   :  { %1501 = vsyncadd [#allocation18], 4294967168 }
 0x3d9   :  { %1181 = vsyncpa [#allocation6], 1 }
 0x3da   :  { %1182 = vsyncpa [#allocation9], 1 }
 0x3db   :  { %1183 = vsyncpa [#allocation12], 1 }
 0x3dc   :  { %1184 = vsyncpa [#allocation7], 1 }
 0x3dd   :  { %1185 = vsyncpa [#allocation15], 1 }
 0x3de   :  { %1186 = vsyncpa [#allocation18], 1 }

</bundles_post_ra>
